<compile_context>
chip_gen: v5e
topology: v5e:2x2
jax: 0.10.0
libtpu: 0.0.40
codegen_flags: <defaults>
</compile_context>

<pallas_src>
import functools

import jax
import jax.numpy as jnp
from jax.experimental import pallas as pl
from jax.experimental.pallas import tpu as pltpu


def _bnprelu_kernel(x_ref, scale_ref, bias_ref, alpha_ref, o_ref, *, rt):
    """Fused BN(fold) + PReLU on one (rt, ct) lane-dense block.

    scale/bias/alpha are full-length resident (rows_pad, 1) columns; slice out
    the rows belonging to the current row block.
    """
    r0 = pl.multiple_of(pl.program_id(0) * rt, rt)
    s = scale_ref[pl.ds(r0, rt), :]          # (rt, 1) — lane broadcast below
    b = bias_ref[pl.ds(r0, rt), :]
    a = alpha_ref[pl.ds(r0, rt), :]
    x = x_ref[...].astype(jnp.float32)       # (rt, ct); math in f32 (safe on v5e)
    t = x * s + b
    o_ref[...] = jnp.where(t >= 0.0, t, a * t).astype(o_ref.dtype)


def bnprelu_forward(x_nchw, gamma, beta, running_mean, running_var, alpha,
                    eps=1e-3, block_bytes=4 << 20, row_cap=512, col_cap=8192):
    """BNPReLU forward. x_nchw: (N, C, H, W); per-channel params: (C,)."""
    N, C, H, W = x_nchw.shape
    rows, cols = N * C, H * W
    dtype = x_nchw.dtype
    dtype_bytes = jnp.dtype(dtype).itemsize
    # Sublane quantum is dtype-dependent: sub-32-bit dtypes pack along sublanes.
    sub_q = {4: 8, 2: 16, 1: 32}.get(dtype_bytes, 8)

    # ---- fold BN running stats into per-channel scale/bias (inference) ----
    scale = (gamma.astype(jnp.float32)
             / jnp.sqrt(running_var.astype(jnp.float32) + eps))
    bias = beta.astype(jnp.float32) - running_mean.astype(jnp.float32) * scale

    # ---- choose tiles against the per-block byte budget ----
    # Prefer full-width column blocks (ct = cols): a single contiguous HBM
    # burst per block and fully lane-dense stores. Only tile the lane axis
    # when even a minimal full-width row slab exceeds the budget.
    min_rows = min(sub_q, rows)
    if cols * dtype_bytes * min_rows <= block_bytes:
        ct = cols                                    # full extent -> always legal
    else:
        ct = (block_bytes // (sub_q * dtype_bytes)) // 128 * 128
        ct = max(128, min(ct, col_cap))
        if ct >= cols:
            ct = cols
    max_rt = max(1, block_bytes // (ct * dtype_bytes))
    rt = min(rows, row_cap, max_rt)
    rt = max(sub_q, (rt // sub_q) * sub_q)           # multiple of sublane quantum
    if rt >= rows:
        rt = rows                                    # full extent -> always legal

    grid_r = pl.cdiv(rows, rt)
    grid_c = pl.cdiv(cols, ct)

    # Keep >= 2 total grid points when the row extent allows it so both v7x
    # TensorCores can be fed ("parallel" grid axes are sharded across cores).
    # TODO(synk): gate on a 2-TC chip (pltpu.get_tpu_info) / CORE_PARALLEL.
    if grid_r * grid_c < 2 and rows >= 2 * sub_q:
        rt = ((pl.cdiv(rows, 2) + sub_q - 1) // sub_q) * sub_q
        grid_r = pl.cdiv(rows, rt)

    rows_pad = grid_r * rt

    # ---- per-row (N*C) params, padded to rows_pad, kept VMEM-resident ----
    def per_row(vec_c):
        v = jnp.tile(vec_c.astype(jnp.float32), N)[:, None]    # (rows, 1)
        if rows_pad > rows:
            v = jnp.pad(v, ((0, rows_pad - rows), (0, 0)))
        return v

    scale_r = per_row(scale)
    bias_r = per_row(bias)
    alpha_r = per_row(alpha)

    # Lane-dense 2-D view: rows = N*C (sublanes), cols = H*W (lanes).
    x2 = x_nchw.reshape(rows, cols)

    # VMEM budget: in + out double-buffered (~4x block) + f32 temporaries and
    # headroom; cap at 48 MiB so it also fits v7x's 64 MiB-per-TC VMEM.
    blk = rt * ct * dtype_bytes
    vmem_limit = int(min(48 << 20, max(32 << 20, 8 * blk)))

    out = pl.pallas_call(
        functools.partial(_bnprelu_kernel, rt=rt),
        out_shape=jax.ShapeDtypeStruct((rows, cols), dtype),
        grid=(grid_r, grid_c),
        in_specs=[
            pl.BlockSpec((rt, ct), lambda i, j: (i, j)),
            pl.BlockSpec((rows_pad, 1), lambda i, j: (0, 0)),   # resident params
            pl.BlockSpec((rows_pad, 1), lambda i, j: (0, 0)),
            pl.BlockSpec((rows_pad, 1), lambda i, j: (0, 0)),
        ],
        out_specs=pl.BlockSpec((rt, ct), lambda i, j: (i, j)),
        compiler_params=pltpu.CompilerParams(
            dimension_semantics=("parallel", "parallel"),
            vmem_limit_bytes=vmem_limit),
    )(x2, scale_r, bias_r, alpha_r)

    return out.reshape(N, C, H, W)


def bnprelu_reference(x, gamma, beta, mean, var, alpha, eps=1e-3):
    """Pure-JAX reference (inference-mode BN + per-channel PReLU)."""
    scale = gamma / jnp.sqrt(var + eps)
    bias = beta - mean * scale
    t = x * scale[None, :, None, None] + bias[None, :, None, None]
    return jnp.where(t >= 0, t, alpha[None, :, None, None] * t)


if __name__ == "__main__":
    key = jax.random.PRNGKey(0)
    ks = jax.random.split(key, 5)

    N, C, H, W = 2, 32, 16, 16          # nIn = 32
    x = jax.random.normal(ks[0], (N, C, H, W), jnp.float32)
    gamma = 1.0 + 0.1 * jax.random.normal(ks[1], (C,), jnp.float32)
    beta = 0.1 * jax.random.normal(ks[2], (C,), jnp.float32)
    running_mean = 0.1 * jax.random.normal(ks[3], (C,), jnp.float32)
    running_var = 0.8 + 0.2 * jnp.abs(jax.random.normal(ks[4], (C,), jnp.float32))
    alpha = jnp.full((C,), 0.25, jnp.float32)   # PReLU default init

    out = bnprelu_forward(x, gamma, beta, running_mean, running_var, alpha)
    out = jax.block_until_ready(out)
    assert out.shape == (N, C, H, W)

    ref = bnprelu_reference(x, gamma, beta, running_mean, running_var, alpha)
    err = float(jnp.max(jnp.abs(out - ref)))
    assert err < 1e-5, f"max abs err {err}"

    print("KERNEL_OK")
</pallas_src>

<mosaic_0001>
module attributes {stable_mosaic.version = 11 : i64} {
  func.func @_bnprelu_kernel(%arg0: i32, %arg1: i32, %arg2: memref<32x256xf32, #tpu.memory_space<vmem>>, %arg3: memref<64x1xf32, #tpu.memory_space<vmem>>, %arg4: memref<64x1xf32, #tpu.memory_space<vmem>>, %arg5: memref<64x1xf32, #tpu.memory_space<vmem>>, %arg6: memref<32x256xf32, #tpu.memory_space<vmem>>) attributes {dimension_semantics = [#tpu.dimension_semantics<parallel>, #tpu.dimension_semantics<parallel>], iteration_bounds = array<i64: 2, 1>, scalar_prefetch = 0 : i64, scratch_operands = 0 : i64, tpu.core_type = #tpu.core_type<tc>, window_params = [{transform_indices = @transform_0, window_bounds = array<i64: 32, 256>}, {pipeline_mode = #tpu.pipeline_mode<synchronous>, transform_indices = @transform_1, window_bounds = array<i64: 64, 1>}, {pipeline_mode = #tpu.pipeline_mode<synchronous>, transform_indices = @transform_2, window_bounds = array<i64: 64, 1>}, {pipeline_mode = #tpu.pipeline_mode<synchronous>, transform_indices = @transform_3, window_bounds = array<i64: 64, 1>}, {transform_indices = @transform_4, window_bounds = array<i64: 32, 256>}]} {
    %c32_i32 = arith.constant 32 : i32
    %0 = arith.muli %arg0, %c32_i32 : i32
    %1 = tpu.assume_multiple %0, 32 : i32
    %2 = arith.index_cast %1 : i32 to index
    %c0 = arith.constant 0 : index
    %3 = vector.load %arg3[%2, %c0] : memref<64x1xf32, #tpu.memory_space<vmem>>, vector<32x1xf32>
    %4 = arith.index_cast %1 : i32 to index
    %c0_0 = arith.constant 0 : index
    %5 = vector.load %arg4[%4, %c0_0] : memref<64x1xf32, #tpu.memory_space<vmem>>, vector<32x1xf32>
    %6 = arith.index_cast %1 : i32 to index
    %c0_1 = arith.constant 0 : index
    %7 = vector.load %arg5[%6, %c0_1] : memref<64x1xf32, #tpu.memory_space<vmem>>, vector<32x1xf32>
    %c0_2 = arith.constant 0 : index
    %c0_3 = arith.constant 0 : index
    %8 = vector.load %arg2[%c0_2, %c0_3] : memref<32x256xf32, #tpu.memory_space<vmem>>, vector<32x256xf32>
    %9 = vector.broadcast %3 : vector<32x1xf32> to vector<32x256xf32>
    %10 = arith.mulf %8, %9 : vector<32x256xf32>
    %11 = vector.broadcast %5 : vector<32x1xf32> to vector<32x256xf32>
    %12 = arith.addf %10, %11 : vector<32x256xf32>
    %cst = arith.constant 0.000000e+00 : f32
    %13 = vector.broadcast %cst : f32 to vector<32x256xf32>
    %14 = arith.cmpf oge, %12, %13 : vector<32x256xf32>
    %15 = vector.broadcast %7 : vector<32x1xf32> to vector<32x256xf32>
    %16 = arith.mulf %15, %12 : vector<32x256xf32>
    %17 = arith.select %14, %12, %16 : vector<32x256xi1>, vector<32x256xf32>
    %c0_4 = arith.constant 0 : index
    %c0_5 = arith.constant 0 : index
    %18 = vector.load %arg6[%c0_4, %c0_5] : memref<32x256xf32, #tpu.memory_space<vmem>>, vector<32x256xf32>
    tpu.vector_store %arg6[%c0_4, %c0_5], %17 {strides = array<i32>} : memref<32x256xf32, #tpu.memory_space<vmem>>, vector<32x256xf32>,
    return
  }
  func.func @transform_0(%arg0: i32, %arg1: i32) -> (i32, i32) {
    %c0_i32 = arith.constant 0 : i32
    return %arg0, %arg1 : i32, i32
  }
  func.func @transform_1(%arg0: i32, %arg1: i32) -> (i32, i32) {
    %c0_i32 = arith.constant 0 : i32
    %c0_i32_0 = arith.constant 0 : i32
    %c0_i32_1 = arith.constant 0 : i32
    return %c0_i32, %c0_i32_0 : i32, i32
  }
  func.func @transform_2(%arg0: i32, %arg1: i32) -> (i32, i32) {
    %c0_i32 = arith.constant 0 : i32
    %c0_i32_0 = arith.constant 0 : i32
    %c0_i32_1 = arith.constant 0 : i32
    return %c0_i32, %c0_i32_0 : i32, i32
  }
  func.func @transform_3(%arg0: i32, %arg1: i32) -> (i32, i32) {
    %c0_i32 = arith.constant 0 : i32
    %c0_i32_0 = arith.constant 0 : i32
    %c0_i32_1 = arith.constant 0 : i32
    return %c0_i32, %c0_i32_0 : i32, i32
  }
  func.func @transform_4(%arg0: i32, %arg1: i32) -> (i32, i32) {
    %c0_i32 = arith.constant 0 : i32
    return %arg0, %arg1 : i32, i32
  }
}

</mosaic_0001>

<bundles_post_ra>
// kernel: tpu_custom_call.1
= control target key start
LH: loop header
LB: loop body
LE: loop exit
PB: predicated region body
PF: predicated region fallthrough
CT: control target
= control target key end

     0   :  { %9 = vsyncpa [#allocation3], 0  ;;  %s788_s0 = inlined_call_operand.vmem [shape: f32[64,256], index: 0, kind: input, shape index: {}]   ;;  %s789_s1 = inlined_call_operand.vmem [shape: f32[64,1], index: 1, kind: input, shape index: {}]   ;;  %s790_s2 = inlined_call_operand.vmem [shape: f32[64,1], index: 2, kind: input, shape index: {}]   ;;  %s791_s3 = inlined_call_operand.vmem [shape: f32[64,1], index: 3, kind: input, shape index: {}]   ;;  %s792_s4 = inlined_call_operand.hbm [shape: f32[64,256], index: 4, kind: output, shape index: {}]  }
   0x1   :  { %11 = vsyncpa [#allocation3 + $0x1], 0  ;;  %s657_s15 = smov 0   ;;  %s659_s16 = smov 0  }
   0x2   :  { %s661_s17 = smov 0   ;;  %s663_s18 = smov 0  }
   0x3   :  { %s665_s19 = smov 0   ;;  %s667_s20 = smov 0  }
   0x4 LB: > { %s469_s21 = sadd.s32 4294967295, %s627_s20   ;;  %s470_s22 = sadd.s32 4294967294, %s627_s20   ;;  %s627_s20 = sphi %s667_s20, %s17_s20   ;;  %s623_s19 = sphi %s665_s19, %s799_s19   ;;  %s619_s18 = sphi %s663_s18, %s798_s18   ;;  %s615_s17 = sphi %s661_s17, %s797_s17   ;;  %s611_s16 = sphi %s659_s16, %s796_s16   ;;  %s607_s15 = sphi %s657_s15, %s795_s15  }
   0x5   : > { %s29_s23 = sadd.s32 1, %s623_s19  ;;  %s129_s24 = sadd.s32 1, %s615_s17 }
   0x6   : > { %p31_p0 = scmp.ge.s32.totalorder %s29_s23, 2  ;;  %p139_p1 = scmp.ne.s32.totalorder %s615_s17, %s611_s16 }
   0x7   : > { %p140_p2 = scmp.eq.s32.totalorder %s469_s21, 1  ;;  %p145_p3 = scmp.ne.s32.totalorder %s611_s16, %s607_s15 }
   0x8   : > { %s801_s23 = smov (%p31_p0, %s29_s23), 0  ;;  %p146_p5 = scmp.eq.s32.totalorder %s470_s22, 1 }
   0x9   : > { %p697_p4 = por %p140_p2, %p139_p1  ;;  %s124_s26 = ssub.s32 %s623_s19, %s801_s23 }
   0xa   : > { %p473_p6 = scmp.ge.s32.totalorder %s627_s20, 1  ;;  %p127_p7 = scmp.eq.s32.totalorder %s124_s26, 0 }
   0xb   : > { %p704_p8 = por %p146_p5, %p145_p3  ;;  %p188_p9 = scmp.lt.s32.totalorder %s627_s20, 3 }
   0xc   : > { %s710_s28 = scalar_select %p127_p7, %s615_s17, %s129_s24  }
   0xd   : > { %p189_p10 = pnand %p473_p6, %p188_p9 }
   0xe   : > { %s478_s29 = sshll.u32 (!%p189_p10), %s619_s18, 5  ;;  %s475_s13 = sshll.u32 (!%p189_p10), %s619_s18, 2 }
   0xf   : > { %192 = sbr.rel (%p189_p10) target bundleno = 172 (0xac), region = 36  ;;  %s239_s6 = scalar_lea.vmem (!%p189_p10), %s790_s2, %s478_s29 }
  0x10   : > { %s234_s9 = scalar_lea.vmem (!%p189_p10), %s789_s1, %s478_s29  ;;  %s244_s12 = scalar_lea.vmem (!%p189_p10), %s791_s3, %s478_s29 }
  0x11   : > { %p221_p11 = scmp.lt.s32.totalorder (!%p189_p10), %s475_s13, 7  ;;  %s216_s26 = sand.u32 (!%p189_p10), 1, %s611_s16  }
  0x12   : > { %s474_s29 = sshll.u32 (!%p189_p10), %s216_s26, 6  ;;  %s487_s5 = sshll.u32 (!%p189_p10), %s619_s18, 6 }
  0x13   : > { %s733_s30 = scalar_lea.vmem (!%p189_p10), [#allocation2], %s474_s29  ;;  %s380_s8 = scalar_lea.hbm (!%p189_p10), %s792_s4, %s487_s5 }
  0x14   : > { %v629_v0 = vmov 0   ;;  %v240_v1 = vld [vmem:[%s239_s6] sm:$0xff]  ;;  %v237_v2 = vld [vmem:[%s234_s9 + $0x10] sm:$0xff]  ;;  %v241_v4 = vld [vmem:[%s239_s6 + $0x8] sm:$0xff]  ;;  %s803_s13 = smov (!%p221_p11, %s475_s13), 7  ;;  %s381_s18 = sshll.u32 %s733_s30, 4  ;;  %s382_s18 = int_to_ptr.vmem [resolvable:$true] %s381_s18 }
  0x15   : > { %548 = vset.pattern.permute.xlu2 %v629_v0  ;;  %547 = vset.pattern.permute.xlu1 %v629_v0  ;;  %v235_v3 = vld [vmem:[%s234_s9] sm:$0xff]  ;;  %v238_v5 = vld [vmem:[%s234_s9 + $0x18] sm:$0xff]  ;;  %v236_v6 = vld [vmem:[%s234_s9 + $0x8] sm:$0xff]  ;;  %s485_s14 = sshll.u32 %s803_s13, 4  ;;  %s383_s9 = sshll.u32 %s380_s8, 4  ;;  %s384_s9 = int_to_ptr.hbm [resolvable:$true] %s383_s9 }
  0x16   : > { %546 = vset.pattern.permute.xlu0 %v629_v0  ;;  %287 = vperm.xlu2 %548, %v240_v1   ;;  %v245_v7 = vld [vmem:[%s244_s12] sm:$0xff]  ;;  %v243_v8 = vld [vmem:[%s239_s6 + $0x18] sm:$0xff]  ;;  %v242_v9 = vld [vmem:[%s239_s6 + $0x10] sm:$0xff]  ;;  %s726_s24 = scalar_lea.vmem %s788_s0, %s485_s14  ;;  %s366_s10 = scalar_lea.sflag [#allocation3], %s216_s26 }
  0x17   : > { %269 = vperm.xlu1 %547, %v237_v2   ;;  %259 = vperm.xlu0 %546, %v235_v3   ;;  %v248_v10 = vld [vmem:[%s244_s12 + $0x18] sm:$0xff]  ;;  %v247_v11 = vld [vmem:[%s244_s12 + $0x10] sm:$0xff]  ;;  %v246_v12 = vld [vmem:[%s244_s12 + $0x8] sm:$0xff]  ;;  %s563_s11 = sshra.s32 %s384_s9, 4  ;;  %s569_s21 = scalar_lea.hbm %s792_s4, 128  ;;  %s564_s11 = int_to_ptr.hbm [resolvable:$true] %s563_s11 }
  0x18   : > { %v249_v15 = vld [vmem:[%s726_s24] sm:$0xff]  ;;  %v250_v16 = vld [vmem:[%s726_s24 + $0x8] sm:$0xff]  ;;  %v255_v30 = vld [vmem:[%s726_s24 + $0x30] sm:$0xff]  ;;  %s565_s12 = scalar_lea.hbm %s564_s11, 64  ;;  %p570_p1 = scmp.lt.s32.totalorder %s564_s11, %s792_s4 }
  0x19   : > { %v256_v31 = vld [vmem:[%s726_s24 + $0x38] sm:$0xff]  ;;  %v251_v34 = vld [vmem:[%s726_s24 + $0x10] sm:$0xff]  ;;  %v253_v37 = vld [vmem:[%s726_s24 + $0x20] sm:$0xff]  ;;  %p566_p12 = scmp.ne.s32.totalorder %s564_s11, %s565_s12  ;;  %p571_p2 = scmp.lt.s32.totalorder %s569_s21, %s565_s12 }
  0x1a   : > { %v252_v35 = vld [vmem:[%s726_s24 + $0x18] sm:$0xff]  ;;  %v254_v38 = vld [vmem:[%s726_s24 + $0x28] sm:$0xff] }
  0x1b   : > { %p567_p13 = pnand %p566_p12, %p697_p4  ;;  %p572_p3 = por %p571_p2, %p570_p1 }
  0x1d   : > { %p568_p0 = pneg %p567_p13 }
  0x1e   : > { %292 = vperm.xlu2 %548, %v241_v4  }
  0x1f   : > { %274 = vperm.xlu1 %547, %v238_v5   ;;  %264 = vperm.xlu0 %546, %v236_v6   ;;  %p573_p5 = pnand %p572_p3, %p568_p0 }
  0x26   : > { %323 = vperm.xlu2 %548, %v245_v7  }
  0x27   : > { %302 = vperm.xlu1 %547, %v243_v8   ;;  %297 = vperm.xlu0 %546, %v242_v9  }
  0x2e   : > { %338 = vperm.xlu2 %548, %v248_v10  }
  0x2f   : > { %333 = vperm.xlu1 %547, %v247_v11   ;;  %328 = vperm.xlu0 %546, %v246_v12  }
  0x70   : > { %v288_v13 = vpop.permute.xlu2 %287 }
  0x78   : > { %v293_v14 = vpop.permute.xlu2 %292 }
  0x80   : > { %v324_v23 = vpop.permute.xlu2 %323 }
  0x88   : > { %v339_v42 = vpop.permute.xlu2 %338 }
  0x89   : > { %v270_v17 = vpop.permute.xlu1 %269  ;;  %v260_v18 = vpop.permute.xlu0 %259 }
  0x8a   : > { %v277_v19 = vmul.f32 %v260_v18, %v249_v15  ;;  %v278_v20 = vmul.f32 %v260_v18, %v250_v16  ;;  %v281_v47 = vmul.f32 %v270_v17, %v253_v37  ;;  %v282_v48 = vmul.f32 %v270_v17, %v254_v38 }
  0x8c   : > { %v305_v21 = vadd.f32 %v288_v13, %v277_v19  ;;  %v306_v22 = vadd.f32 %v288_v13, %v278_v20 }
  0x8e   : > { %vm313_vm0 = vcmp.ge.f32.partialorder %v305_v21, 0.0  ;;  %vm314_vm1 = vcmp.ge.f32.partialorder %v306_v22, 0.0  ;;  %v341_v24 = vmul.f32 %v324_v23, %v305_v21  ;;  %v342_v25 = vmul.f32 %v324_v23, %v306_v22 }
  0x90   : > { %v349_v26 = vsel %vm313_vm0, %v305_v21, %v341_v24  ;;  %v350_v27 = vsel %vm314_vm1, %v306_v22, %v342_v25 }
  0x91   : > { %v275_v28 = vpop.permute.xlu1 %274  ;;  %357 = vst [vmem:[%s733_s30] sm:$0xff] %v349_v26  ;;  %v265_v29 = vpop.permute.xlu0 %264 }
  0x92   : > { %358 = vst [vmem:[%s733_s30 + $0x8] sm:$0xff] %v350_v27  ;;  %v283_v32 = vmul.f32 %v275_v28, %v255_v30  ;;  %v284_v33 = vmul.f32 %v275_v28, %v256_v31  ;;  %v279_v43 = vmul.f32 %v265_v29, %v251_v34  ;;  %v280_v44 = vmul.f32 %v265_v29, %v252_v35 }
  0x94   : > { %v307_v53 = vadd.f32 %v293_v14, %v279_v43  ;;  %v308_v54 = vadd.f32 %v293_v14, %v280_v44 }
  0x96   : > { %vm315_vm6 = vcmp.ge.f32.partialorder %v307_v53, 0.0  ;;  %vm316_vm7 = vcmp.ge.f32.partialorder %v308_v54, 0.0 }
  0x99   : > { %v303_v36 = vpop.permute.xlu1 %302  ;;  %v298_v41 = vpop.permute.xlu0 %297 }
  0x9a   : > { %v311_v39 = vadd.f32 %v303_v36, %v283_v32  ;;  %v312_v40 = vadd.f32 %v303_v36, %v284_v33  ;;  %v309_v51 = vadd.f32 %v298_v41, %v281_v47  ;;  %v310_v52 = vadd.f32 %v298_v41, %v282_v48 }
  0x9c   : > { %vm319_vm2 = vcmp.ge.f32.partialorder %v311_v39, 0.0  ;;  %vm320_vm3 = vcmp.ge.f32.partialorder %v312_v40, 0.0  ;;  %v347_v45 = vmul.f32 %v339_v42, %v311_v39  ;;  %v348_v46 = vmul.f32 %v339_v42, %v312_v40 }
  0x9d   : > { %vm317_vm4 = vcmp.ge.f32.partialorder %v309_v51, 0.0  ;;  %vm318_vm5 = vcmp.ge.f32.partialorder %v310_v52, 0.0 }
  0x9e   : > { %v355_v49 = vsel %vm319_vm2, %v311_v39, %v347_v45  ;;  %v356_v50 = vsel %vm320_vm3, %v312_v40, %v348_v46 }
  0x9f   : > { %363 = vst [vmem:[%s733_s30 + $0x30] sm:$0xff] %v355_v49 }
  0xa0   : > { %364 = vst [vmem:[%s733_s30 + $0x38] sm:$0xff] %v356_v50 }
  0xa1   : > { %v334_v55 = vpop.permute.xlu1 %333  ;;  %v329_v58 = vpop.permute.xlu0 %328 }
  0xa2   : > { %v345_v56 = vmul.f32 %v334_v55, %v309_v51  ;;  %v346_v57 = vmul.f32 %v334_v55, %v310_v52  ;;  %v343_v59 = vmul.f32 %v329_v58, %v307_v53  ;;  %v344_v60 = vmul.f32 %v329_v58, %v308_v54 }
  0xa4   : > { %v353_v61 = vsel %vm317_vm4, %v309_v51, %v345_v56  ;;  %v354_v62 = vsel %vm318_vm5, %v310_v52, %v346_v57  ;;  %v351_v63 = vsel %vm315_vm6, %v307_v53, %v343_v59  ;;  %v352_v0 = vsel %vm316_vm7, %v308_v54, %v344_v60 }
  0xa5   : > { %361 = vst [vmem:[%s733_s30 + $0x20] sm:$0xff] %v353_v61 }
  0xa6   : > { %362 = vst [vmem:[%s733_s30 + $0x28] sm:$0xff] %v354_v62 }
  0xa7   : > { %359 = vst [vmem:[%s733_s30 + $0x10] sm:$0xff] %v351_v63 }
  0xa8   : > { %360 = vst [vmem:[%s733_s30 + $0x18] sm:$0xff] %v352_v0 }
  0xa9   : > { %576 = shalt.err (!%p573_p5)
}
  0xaa   : > { %s630_s26 = smov 256   ;;  %s631_s29 = smov 16  }
  0xab   : > { %488 = dma.vmem_to_hbm [thread:$0]  (%p697_p4), %s382_s18, 1024, %s384_s9, %s366_s10, %s630_s26, %s630_s26, %s631_s29  }
  0xac PF: > { %p494_p6 = scmp.ge.s32.totalorder %s627_s20, 2  ;;  %s398_s30 = sand.u32 1, %s607_s15  }
  0xad   : > { %s399_s5 = scalar_lea.sflag [#allocation3], %s398_s30 }
  0xae   : > { %p491_p7 = pnand %p494_p6, %p704_p8 }
  0xb0   : > { %p492_p9 = pneg %p491_p7 }
  0xb2   : > { %602 = dma.done.wait (%p492_p9), %s399_s5, 1024  }
  0xb3   : > { %604 = vsyncadd (%p492_p9), %s399_s5, 4294966272  ;;  %s17_s20 = sadd.s32 1, %s627_s20   ;;  %s795_s15 = smov %s611_s16 }
  0xb4   : > { %p14_p10 = scmp.ge.s32.totalorder %s17_s20, 4   ;;  %s796_s16 = smov %s615_s17 }
  0xb5   : > { %s797_s17 = smov %s710_s28  ;;  %s798_s18 = smov %s623_s19 }
  0xb6   : > { %s799_s19 = smov %s801_s23  ;;  %16 = sbr.rel (!%p14_p10) target bundleno = 4 (0x4), region = 74 }
  0xbb   :  { %405 = vsyncpa [#allocation3], 1 }
  0xbc   :  { %407 = vsyncpa [#allocation3 + $0x1], 1 }

</bundles_post_ra>
